<compile_context>
chip_gen: v7x
topology: tpu7x:2x2x1
jax: 0.10.0
libtpu: 0.0.40
codegen_flags: <defaults>
</compile_context>

<pallas_src>
import jax
import jax.numpy as jnp
from jax import lax
from jax.experimental import pallas as pl
from jax.experimental.pallas import tpu as pltpu

LANE = 128                          # TPU lane width; tiles are multiples of this
TARGET_TILE_BYTES = 2 * 1024 * 1024  # ~2 MiB of x per tile
MAX_TILE_B = 16384


def _round_up(n, m):
    return ((n + m - 1) // m) * m


def _mlp_kernel(x_ref, w1_ref, b1_ref, w2_ref, b2_ref, w3_ref, b3_ref, o_ref):
    # x_ref: (TILE_B, D) f32, streamed from HBM in its native layout.
    # Weights are PyTorch-layout (out, in); biases are (out, 1) so they
    # broadcast along lanes (batch lives on lanes for every activation:
    # (16, TB) -> (8, TB) -> (1, TB) lane-dense output store).
    x = x_ref[...]
    hp = lax.Precision.HIGHEST
    # h1 = W1 @ x^T via transposed-RHS contraction: no wrapper transpose and
    # no in-kernel XLU relayout; result is (16, TILE_B) with batch on lanes.
    h1 = lax.dot_general(w1_ref[...], x, (((1,), (1,)), ((), ())),
                         precision=hp, preferred_element_type=jnp.float32)
    h1 = jnp.maximum(h1 + b1_ref[...], 0.0)
    h2 = jnp.dot(w2_ref[...], h1, precision=hp,
                 preferred_element_type=jnp.float32)          # (8, TB)
    h2 = jnp.maximum(h2 + b2_ref[...], 0.0)
    out = jnp.dot(w3_ref[...], h2, precision=hp,
                  preferred_element_type=jnp.float32)         # (1, TB)
    o_ref[...] = (out + b3_ref[...]).astype(o_ref.dtype)


def covid19_regression_forward(x, params, max_tile_b=MAX_TILE_B):
    """x: (B, D) float32. params: PyTorch-layout (w(out,in), b(out,)) x 3.
    Returns (B,) float32 — matches PyTorch forward + squeeze(1)."""
    w1, b1, w2, b2, w3, b3 = params
    B, D = x.shape

    # Tile the batch:
    #  * ~2 MiB of x per tile (amortize per-grid-step overhead),
    #  * cap so large batches keep >= 2 grid steps (v7x 2-TC sharding),
    #  * multiples of 128 lanes, floor at 128.
    bytes_cap = max(LANE, (TARGET_TILE_BYTES // (D * 4)) // LANE * LANE)
    two_step_cap = _round_up(pl.cdiv(B, 2), LANE)
    tile_b = max(LANE, min(max_tile_b, bytes_cap, two_step_cap))
    grid = (pl.cdiv(B, tile_b),)

    xf = x.astype(jnp.float32)
    w1c = w1.astype(jnp.float32)
    w2c = w2.astype(jnp.float32)
    w3c = w3.astype(jnp.float32)
    b1c = b1.reshape(16, 1).astype(jnp.float32)
    b2c = b2.reshape(8, 1).astype(jnp.float32)
    b3c = b3.reshape(1, 1).astype(jnp.float32)

    flops = 2 * B * (D * 16 + 16 * 8 + 8 * 1)
    bytes_accessed = (xf.size + B + w1c.size + w2c.size + w3c.size
                      + b1c.size + b2c.size + b3c.size) * 4

    out2d = pl.pallas_call(
        _mlp_kernel,
        out_shape=jax.ShapeDtypeStruct((1, B), jnp.float32),
        grid=grid,
        in_specs=[
            pl.BlockSpec((tile_b, D), lambda i: (i, 0)),   # x: streamed, native layout
            pl.BlockSpec((16, D), lambda i: (0, 0)),       # w1: VMEM-resident
            pl.BlockSpec((16, 1), lambda i: (0, 0)),       # b1
            pl.BlockSpec((8, 16), lambda i: (0, 0)),       # w2
            pl.BlockSpec((8, 1), lambda i: (0, 0)),        # b2
            pl.BlockSpec((1, 8), lambda i: (0, 0)),        # w3
            pl.BlockSpec((1, 1), lambda i: (0, 0)),        # b3
        ],
        out_specs=pl.BlockSpec((1, tile_b), lambda i: (0, i)),  # lane-dense output
        compiler_params=pltpu.CompilerParams(
            dimension_semantics=("parallel",),
            vmem_limit_bytes=32 * 1024 * 1024,
        ),
        cost_estimate=pl.CostEstimate(
            flops=flops, transcendentals=0, bytes_accessed=bytes_accessed),
    )(xf, w1c, b1c, w2c, b2c, w3c, b3c)

    return out2d[0]


def init_params(key, input_dim):
    """PyTorch default Linear init: U(-k, k), k = 1/sqrt(fan_in).
    Weights stored PyTorch-style as (out_features, in_features), biases (out,)."""
    dims = [(input_dim, 16), (16, 8), (8, 1)]
    params = []
    for fan_in, fan_out in dims:
        key, kw, kb = jax.random.split(key, 3)
        bound = 1.0 / jnp.sqrt(jnp.asarray(fan_in, jnp.float32))
        w = jax.random.uniform(kw, (fan_out, fan_in), jnp.float32, -bound, bound)
        b = jax.random.uniform(kb, (fan_out,), jnp.float32, -bound, bound)
        params += [w, b]
    return tuple(params)


def _reference(x, params):
    """Pure-JAX f32 reference matching the PyTorch forward."""
    w1, b1, w2, b2, w3, b3 = params
    hp = lax.Precision.HIGHEST
    h1 = jnp.maximum(jnp.dot(x, w1.T, precision=hp) + b1, 0.0)
    h2 = jnp.maximum(jnp.dot(h1, w2.T, precision=hp) + b2, 0.0)
    return (jnp.dot(h2, w3.T, precision=hp) + b3)[:, 0]


if __name__ == "__main__":
    key = jax.random.PRNGKey(0)

    # Small example consistent with the module (tabular regression rows).
    batch, input_dim = 8, 32
    key, kx = jax.random.split(key)
    x = jax.random.normal(kx, (batch, input_dim), jnp.float32)
    params = init_params(key, input_dim)

    y = covid19_regression_forward(x, params)
    jax.block_until_ready(y)
    assert y.shape == (batch,)
    ref = _reference(x, params)
    assert jnp.allclose(y, ref, atol=5e-3, rtol=5e-3), float(jnp.max(jnp.abs(y - ref)))

    # Second check exercising a multi-step grid with a ragged last tile
    # (B=4500 -> tile_b=2304, 2 grid steps, second tile only partially valid).
    key, kx2 = jax.random.split(key)
    big_b = 4500
    x_big = jax.random.normal(kx2, (big_b, input_dim), jnp.float32)
    y_big = covid19_regression_forward(x_big, params)
    jax.block_until_ready(y_big)
    assert y_big.shape == (big_b,)
    ref_big = _reference(x_big, params)
    assert jnp.allclose(y_big, ref_big, atol=5e-3, rtol=5e-3), float(
        jnp.max(jnp.abs(y_big - ref_big)))

    print("KERNEL_OK")
</pallas_src>

<mosaic_0001>
module attributes {stable_mosaic.version = 11 : i64} {
  func.func @_mlp_kernel(%arg0: i32, %arg1: memref<128x32xf32, #tpu.memory_space<vmem>>, %arg2: memref<16x32xf32, #tpu.memory_space<vmem>>, %arg3: memref<16x1xf32, #tpu.memory_space<vmem>>, %arg4: memref<8x16xf32, #tpu.memory_space<vmem>>, %arg5: memref<8x1xf32, #tpu.memory_space<vmem>>, %arg6: memref<1x8xf32, #tpu.memory_space<vmem>>, %arg7: memref<1x1xf32, #tpu.memory_space<vmem>>, %arg8: memref<1x128xf32, #tpu.memory_space<vmem>>) attributes {dimension_semantics = [#tpu.dimension_semantics<parallel>], iteration_bounds = array<i64: 1>, scalar_prefetch = 0 : i64, scratch_operands = 0 : i64, tpu.core_type = #tpu.core_type<tc>, window_params = [{transform_indices = @transform_0, window_bounds = array<i64: 128, 32>}, {pipeline_mode = #tpu.pipeline_mode<synchronous>, transform_indices = @transform_1, window_bounds = array<i64: 16, 32>}, {pipeline_mode = #tpu.pipeline_mode<synchronous>, transform_indices = @transform_2, window_bounds = array<i64: 16, 1>}, {pipeline_mode = #tpu.pipeline_mode<synchronous>, transform_indices = @transform_3, window_bounds = array<i64: 8, 16>}, {pipeline_mode = #tpu.pipeline_mode<synchronous>, transform_indices = @transform_4, window_bounds = array<i64: 8, 1>}, {pipeline_mode = #tpu.pipeline_mode<synchronous>, transform_indices = @transform_5, window_bounds = array<i64: 1, 8>}, {pipeline_mode = #tpu.pipeline_mode<synchronous>, transform_indices = @transform_6, window_bounds = array<i64: 1, 1>}, {transform_indices = @transform_7, window_bounds = array<i64: 1, 128>}]} {
    %c0 = arith.constant 0 : index
    %c0_0 = arith.constant 0 : index
    %0 = vector.load %arg1[%c0, %c0_0] : memref<128x32xf32, #tpu.memory_space<vmem>>, vector<128x32xf32>
    %c0_1 = arith.constant 0 : index
    %c0_2 = arith.constant 0 : index
    %1 = vector.load %arg2[%c0_1, %c0_2] : memref<16x32xf32, #tpu.memory_space<vmem>>, vector<16x32xf32>
    %cst = arith.constant dense<0.000000e+00> : vector<16x128xf32>
    %2 = tpu.matmul %1, %0, %cst {dimension_numbers = #tpu.dot_dimension_numbers<[1], [1], [0], [0], [0, 0, 1, 0], [], []>, precision = #tpu.contract_precision<fp32>} : vector<16x32xf32>, vector<128x32xf32>, vector<16x128xf32> -> vector<16x128xf32>
    %c0_3 = arith.constant 0 : index
    %c0_4 = arith.constant 0 : index
    %3 = vector.load %arg3[%c0_3, %c0_4] : memref<16x1xf32, #tpu.memory_space<vmem>>, vector<16x1xf32>
    %4 = vector.broadcast %3 : vector<16x1xf32> to vector<16x128xf32>
    %5 = arith.addf %2, %4 : vector<16x128xf32>
    %cst_5 = arith.constant 0.000000e+00 : f32
    %6 = vector.broadcast %cst_5 : f32 to vector<16x128xf32>
    %7 = arith.maximumf %5, %6 : vector<16x128xf32>
    %c0_6 = arith.constant 0 : index
    %c0_7 = arith.constant 0 : index
    %8 = vector.load %arg4[%c0_6, %c0_7] : memref<8x16xf32, #tpu.memory_space<vmem>>, vector<8x16xf32>
    %cst_8 = arith.constant dense<0.000000e+00> : vector<8x128xf32>
    %9 = tpu.matmul %8, %7, %cst_8 {dimension_numbers = #tpu.dot_dimension_numbers<[1], [0], [0], [1], [0, 0, 1, 1], [], []>, precision = #tpu.contract_precision<fp32>} : vector<8x16xf32>, vector<16x128xf32>, vector<8x128xf32> -> vector<8x128xf32>
    %c0_9 = arith.constant 0 : index
    %c0_10 = arith.constant 0 : index
    %10 = vector.load %arg5[%c0_9, %c0_10] : memref<8x1xf32, #tpu.memory_space<vmem>>, vector<8x1xf32>
    %11 = vector.broadcast %10 : vector<8x1xf32> to vector<8x128xf32>
    %12 = arith.addf %9, %11 : vector<8x128xf32>
    %cst_11 = arith.constant 0.000000e+00 : f32
    %13 = vector.broadcast %cst_11 : f32 to vector<8x128xf32>
    %14 = arith.maximumf %12, %13 : vector<8x128xf32>
    %c0_12 = arith.constant 0 : index
    %c0_13 = arith.constant 0 : index
    %15 = vector.load %arg6[%c0_12, %c0_13] : memref<1x8xf32, #tpu.memory_space<vmem>>, vector<1x8xf32>
    %cst_14 = arith.constant dense<0.000000e+00> : vector<1x128xf32>
    %16 = tpu.matmul %15, %14, %cst_14 {dimension_numbers = #tpu.dot_dimension_numbers<[1], [0], [0], [1], [0, 0, 1, 1], [], []>, precision = #tpu.contract_precision<fp32>} : vector<1x8xf32>, vector<8x128xf32>, vector<1x128xf32> -> vector<1x128xf32>
    %c0_15 = arith.constant 0 : index
    %c0_16 = arith.constant 0 : index
    %17 = vector.load %arg7[%c0_15, %c0_16] : memref<1x1xf32, #tpu.memory_space<vmem>>, vector<1x1xf32>
    %18 = vector.broadcast %17 : vector<1x1xf32> to vector<1x128xf32>
    %19 = arith.addf %16, %18 : vector<1x128xf32>
    %c0_17 = arith.constant 0 : index
    %c0_18 = arith.constant 0 : index
    %20 = vector.load %arg8[%c0_17, %c0_18] : memref<1x128xf32, #tpu.memory_space<vmem>>, vector<1x128xf32>
    tpu.vector_store %arg8[%c0_17, %c0_18], %19 {strides = array<i32>} : memref<1x128xf32, #tpu.memory_space<vmem>>, vector<1x128xf32>,
    return
  }
  func.func @transform_0(%arg0: i32) -> (i32, i32) {
    %c0_i32 = arith.constant 0 : i32
    %c0_i32_0 = arith.constant 0 : i32
    return %arg0, %c0_i32 : i32, i32
  }
  func.func @transform_1(%arg0: i32) -> (i32, i32) {
    %c0_i32 = arith.constant 0 : i32
    %c0_i32_0 = arith.constant 0 : i32
    %c0_i32_1 = arith.constant 0 : i32
    return %c0_i32, %c0_i32_0 : i32, i32
  }
  func.func @transform_2(%arg0: i32) -> (i32, i32) {
    %c0_i32 = arith.constant 0 : i32
    %c0_i32_0 = arith.constant 0 : i32
    %c0_i32_1 = arith.constant 0 : i32
    return %c0_i32, %c0_i32_0 : i32, i32
  }
  func.func @transform_3(%arg0: i32) -> (i32, i32) {
    %c0_i32 = arith.constant 0 : i32
    %c0_i32_0 = arith.constant 0 : i32
    %c0_i32_1 = arith.constant 0 : i32
    return %c0_i32, %c0_i32_0 : i32, i32
  }
  func.func @transform_4(%arg0: i32) -> (i32, i32) {
    %c0_i32 = arith.constant 0 : i32
    %c0_i32_0 = arith.constant 0 : i32
    %c0_i32_1 = arith.constant 0 : i32
    return %c0_i32, %c0_i32_0 : i32, i32
  }
  func.func @transform_5(%arg0: i32) -> (i32, i32) {
    %c0_i32 = arith.constant 0 : i32
    %c0_i32_0 = arith.constant 0 : i32
    %c0_i32_1 = arith.constant 0 : i32
    return %c0_i32, %c0_i32_0 : i32, i32
  }
  func.func @transform_6(%arg0: i32) -> (i32, i32) {
    %c0_i32 = arith.constant 0 : i32
    %c0_i32_0 = arith.constant 0 : i32
    %c0_i32_1 = arith.constant 0 : i32
    return %c0_i32, %c0_i32_0 : i32, i32
  }
  func.func @transform_7(%arg0: i32) -> (i32, i32) {
    %c0_i32 = arith.constant 0 : i32
    %c0_i32_0 = arith.constant 0 : i32
    return %c0_i32, %arg0 : i32, i32
  }
}

</mosaic_0001>

<bundles_post_ra>
// kernel: tpu_custom_call.1
= control target key start
LH: loop header
LB: loop body
LE: loop exit
PB: predicated region body
PF: predicated region fallthrough
CT: control target
= control target key end

     0   :  { %s2817_s0 = inlined_call_operand.vmem [shape: f32[8,32], index: 0, kind: input, shape index: {}]   ;;  %s2818_s1 = inlined_call_operand.vmem [shape: f32[16,32], index: 1, kind: input, shape index: {}]   ;;  %s2819_s2 = inlined_call_operand.vmem [shape: f32[16,1], index: 2, kind: input, shape index: {}]   ;;  %s2820_s3 = inlined_call_operand.vmem [shape: f32[8,16], index: 3, kind: input, shape index: {}]   ;;  %s2821_s4 = inlined_call_operand.vmem [shape: f32[8,1], index: 4, kind: input, shape index: {}]   ;;  %s2822_s5 = inlined_call_operand.vmem [shape: f32[1,8], index: 5, kind: input, shape index: {}]   ;;  %s2823_s6 = inlined_call_operand.<no memory space> [shape: f32[1,1], index: 6, kind: input, shape index: {}]   ;;  %s2824_s7 = inlined_call_operand.hbm [shape: f32[1,8], index: 7, kind: output, shape index: {}]  }
   0x1   :  { %v12_v0 = vstv %s2823_s6 }
   0x2   :  { %13 = vst [vmem:[#allocation2] sm:$0x1] %v12_v0 }
   0x3   :  { %v29_v1 = vld [vmem:[%s2817_s0] sm:$0xff]  ;;  %v30_v2 = vld [vmem:[%s2817_s0 + $0x8] sm:$0xff]  ;;  %vm59_vm0 = vcmask 261120   ;;  %v31_v3 = vld [vmem:[%s2817_s0 + $0x10] sm:$0xff] }
   0x4   :  { %v67_v4 = vsel %vm59_vm0, %v29_v1, 0  ;;  %v70_v5 = vsel %vm59_vm0, %v30_v2, 0  ;;  %v32_v6 = vld [vmem:[%s2817_s0 + $0x18] sm:$0xff]  ;;  %v73_v7 = vsel %vm59_vm0, %v31_v3, 0  ;;  %v33_v12 = vld [vmem:[%s2817_s0 + $0x20] sm:$0xff]  ;;  %v34_v13 = vld [vmem:[%s2817_s0 + $0x28] sm:$0xff] }
   0x5   :  { %v115_v8 = vand.u32 4294901760, %v67_v4  ;;  %v118_v9 = vand.u32 4294901760, %v70_v5  ;;  %v76_v10 = vsel %vm59_vm0, %v32_v6, 0  ;;  %v121_v11 = vand.u32 4294901760, %v73_v7  ;;  %v45_v19 = vld [vmem:[%s2818_s1] sm:$0xff] }
   0x6   :  { %v124_v14 = vand.u32 4294901760, %v76_v10  ;;  %v79_v17 = vsel %vm59_vm0, %v33_v12, 0  ;;  %v82_v18 = vsel %vm59_vm0, %v34_v13, 0 }
   0x7   :  { %v2512_v15 = vpack.c.bf16 %v118_v9, %v115_v8 }
   0x8   :  { %v2514_v16 = vpack.c.bf16 %v124_v14, %v121_v11 }
   0x9   :  { %2168 = vmatprep.subr.bf16.mxu1 %v2512_v15  ;;  %2264 = vmatprep.subr.bf16.mxu0 %v2512_v15 }
   0xa   :  { %2170 = vmatpush3.bf16.xpose.msra.mxu1 %v2512_v15  ;;  %2266 = vmatpush3.bf16.xpose.msra.mxu0 %v2512_v15 }
   0xb   :  { %14 = vsyncpa [#allocation4], 0  ;;  %2172 = vmatprep.subr.bf16.mxu1 %v2514_v16  ;;  %2268 = vmatprep.subr.bf16.mxu0 %v2514_v16  ;;  %v127_v20 = vand.u32 4294901760, %v79_v17  ;;  %v130_v21 = vand.u32 4294901760, %v82_v18  ;;  %v35_v22 = vld [vmem:[%s2817_s0 + $0x30] sm:$0xff]  ;;  %v36_v23 = vld [vmem:[%s2817_s0 + $0x38] sm:$0xff]  ;;  %v2572_v46 = vsub.f32 %v67_v4, %v115_v8  ;;  %v2574_v47 = vsub.f32 %v70_v5, %v118_v9 }
   0xc   :  { %v61_v24 = vsel %vm59_vm0, %v45_v19, 0  ;;  %v85_v27 = vsel %vm59_vm0, %v35_v22, 0  ;;  %v88_v28 = vsel %vm59_vm0, %v36_v23, 0  ;;  %v37_v33 = vld [vmem:[%s2817_s0 + $0x40] sm:$0xff]  ;;  %v38_v34 = vld [vmem:[%s2817_s0 + $0x48] sm:$0xff]  ;;  %v39_v42 = vld [vmem:[%s2817_s0 + $0x50] sm:$0xff]  ;;  %v2576_v48 = vsub.f32 %v73_v7, %v121_v11 }
   0xd   :  { %v2534_v25 = vand.u32 4294901760, %v61_v24  ;;  %v2536_v26 = vpack.c.bf16 %v130_v21, %v127_v20  ;;  %v133_v31 = vand.u32 4294901760, %v85_v27  ;;  %v136_v32 = vand.u32 4294901760, %v88_v28  ;;  %v40_v43 = vld [vmem:[%s2817_s0 + $0x58] sm:$0xff]  ;;  %v41_v62 = vld [vmem:[%s2817_s0 + $0x60] sm:$0xff]  ;;  %v42_v63 = vld [vmem:[%s2817_s0 + $0x68] sm:$0xff] }
   0xe   :  { %v91_v38 = vsel %vm59_vm0, %v37_v33, 0  ;;  %v94_v39 = vsel %vm59_vm0, %v38_v34, 0  ;;  %v97_v45 = vsel %vm59_vm0, %v39_v42, 0  ;;  %v2578_v49 = vsub.f32 %v76_v10, %v124_v14  ;;  %v43_v10 = vld [vmem:[%s2817_s0 + $0x70] sm:$0xff]  ;;  %v44_v11 = vld [vmem:[%s2817_s0 + $0x78] sm:$0xff]  ;;  %v46_v13 = vld [vmem:[%s2818_s1 + $0x8] sm:$0xff] }
   0xf   :  { %v2541_v29 = vsub.f32 %v61_v24, %v2534_v25  ;;  %v2555_v37 = vpack.c.bf16 %v136_v32, %v133_v31  ;;  %v139_v40 = vand.u32 4294901760, %v91_v38  ;;  %v142_v41 = vand.u32 4294901760, %v94_v39 }
  0x10   :  { %v100_v50 = vsel %vm59_vm0, %v40_v43, 0  ;;  %v2581_v51 = vsub.f32 %v79_v17, %v127_v20  ;;  %v2583_v52 = vsub.f32 %v82_v18, %v130_v21  ;;  %v2587_v53 = vpack.c.bf16 %v2574_v47, %v2572_v46 }
  0x11   :  { %v197_v30 = vand.u32 4294901760, %v2541_v29  ;;  %v2569_v44 = vpack.c.bf16 %v142_v41, %v139_v40  ;;  %v2591_v54 = vpack.c.bf16 %v2578_v49, %v2576_v48  ;;  %v145_v55 = vand.u32 4294901760, %v97_v45 }
  0x12   :  { %2174 = vmatpush3.bf16.xpose.msra.mxu1 %v2514_v16  ;;  %2270 = vmatpush3.bf16.xpose.msra.mxu0 %v2514_v16  ;;  %v2595_v56 = vsub.f32 %v85_v27, %v133_v31  ;;  %v2597_v57 = vsub.f32 %v88_v28, %v136_v32  ;;  %v148_v58 = vand.u32 4294901760, %v100_v50  ;;  %v2601_v59 = vsub.f32 %v91_v38, %v139_v40 }
  0x13   :  { %2176 = vmatprep.subr.bf16.mxu1 %v2536_v26  ;;  %2272 = vmatprep.subr.bf16.mxu0 %v2536_v26  ;;  %v198_v35 = vsub.f32 %v2541_v29, %v197_v30  ;;  %v2603_v60 = vsub.f32 %v94_v39, %v142_v41  ;;  %v2607_v61 = vpack.c.bf16 %v2583_v52, %v2581_v51  ;;  %v103_v3 = vsel %vm59_vm0, %v41_v62, 0 }
  0x14   :  { %2022 = vmatprep.mubr.f32.mxu0 %v197_v30  ;;  %v2617_v0 = vpack.c.bf16 %v2597_v57, %v2595_v56  ;;  %v2623_v2 = vpack.c.bf16 %v148_v58, %v145_v55  ;;  %v106_v4 = vsel %vm59_vm0, %v42_v63, 0  ;;  %v2627_v5 = vsub.f32 %v97_v45, %v145_v55 }
  0x15   :  { %v199_v36 = vand.u32 4294901760, %v198_v35  ;;  %v2621_v1 = vpack.c.bf16 %v2603_v60, %v2601_v59  ;;  %v2629_v6 = vsub.f32 %v100_v50, %v148_v58  ;;  %v151_v8 = vand.u32 4294901760, %v103_v3 }
  0x16   :  { %v154_v9 = vand.u32 4294901760, %v106_v4  ;;  %v109_v14 = vsel %vm59_vm0, %v43_v10, 0  ;;  %v112_v17 = vsel %vm59_vm0, %v44_v11, 0  ;;  %v64_v20 = vsel %vm59_vm0, %v46_v13, 0 }
  0x17   :  { %1917 = vmatprep.mubr.f32.mxu1 %v199_v36  ;;  %v2635_v7 = vpack.c.bf16 %v2629_v6, %v2627_v5  ;;  %v2652_v18 = vsub.f32 %v103_v3, %v151_v8  ;;  %v157_v22 = vand.u32 4294901760, %v109_v14  ;;  %v160_v23 = vand.u32 4294901760, %v112_v17 }
  0x18   :  { %v2645_v12 = vpack.c.bf16 %v154_v9, %v151_v8  ;;  %v2654_v19 = vsub.f32 %v106_v4, %v154_v9  ;;  %v218_v24 = vand.u32 4294901760, %v2572_v46  ;;  %v225_v27 = vand.u32 4294901760, %v2574_v47 }
  0x19   :  { %v2667_v28 = vand.u32 4294901760, %v64_v20  ;;  %v2669_v30 = vpack.c.bf16 %v160_v23, %v157_v22  ;;  %v2673_v33 = vsub.f32 %v109_v14, %v157_v22  ;;  %v2675_v34 = vsub.f32 %v112_v17, %v160_v23  ;;  %v47_v14 = vld [vmem:[%s2819_s2] sm:$0xff]  ;;  %v48_v23 = vld [vmem:[%s2819_s2 + $0x8] sm:$0xff] }
  0x1a   :  { %2178 = vmatpush3.bf16.xpose.msra.mxu1 %v2536_v26  ;;  %2274 = vmatpush3.bf16.xpose.msra.mxu0 %v2536_v26  ;;  %v2661_v21 = vpack.c.bf16 %v2654_v19, %v2652_v18  ;;  %v219_v31 = vsub.f32 %v2572_v46, %v218_v24  ;;  %v226_v32 = vsub.f32 %v2574_v47, %v225_v27  ;;  %v232_v40 = vand.u32 4294901760, %v2576_v48 }
  0x1b   :  { %2180 = vmatprep.subr.bf16.mxu1 %v2555_v37  ;;  %2276 = vmatprep.subr.bf16.mxu0 %v2555_v37  ;;  %v2678_v35 = vsub.f32 %v64_v20, %v2667_v28  ;;  %v2684_v36 = vpack.c.bf16 %v2675_v34, %v2673_v33  ;;  %v239_v41 = vand.u32 4294901760, %v2578_v49  ;;  %v2295_v45 = vpack.c.bf16 %v225_v27, %v218_v24 }
  0x1c   :  { %v220_v38 = vand.u32 4294901760, %v219_v31  ;;  %v227_v39 = vand.u32 4294901760, %v226_v32  ;;  %v233_v46 = vsub.f32 %v2576_v48, %v232_v40  ;;  %v246_v62 = vand.u32 4294901760, %v2581_v51 }
  0x1d   :  { %v207_v42 = vand.u32 4294901760, %v2678_v35  ;;  %v240_v47 = vsub.f32 %v2578_v49, %v239_v41  ;;  %v253_v63 = vand.u32 4294901760, %v2583_v52  ;;  %v2299_v8 = vpack.c.bf16 %v239_v41, %v232_v40 }
  0x1e   :  { %v2199_v43 = vpack.c.bf16 %v227_v39, %v220_v38  ;;  %v234_v55 = vand.u32 4294901760, %v233_v46  ;;  %v247_v48 = vsub.f32 %v2581_v51, %v246_v62  ;;  %v260_v11 = vand.u32 4294901760, %v2595_v56 }
  0x1f   :  { %v208_v50 = vsub.f32 %v2678_v35, %v207_v42  ;;  %v241_v58 = vand.u32 4294901760, %v240_v47  ;;  %v254_v49 = vsub.f32 %v2583_v52, %v253_v63  ;;  %v267_v13 = vand.u32 4294901760, %v2597_v57 }
  0x20   :  { %v248_v9 = vand.u32 4294901760, %v247_v48  ;;  %v2442_v51 = vmov 0   ;;  %v2303_v17 = vpack.c.bf16 %v253_v63, %v246_v62  ;;  %v261_v20 = vsub.f32 %v2595_v56, %v260_v11 }
  0x21   :  { %v209_v3 = vand.u32 4294901760, %v208_v50  ;;  %v2203_v4 = vpack.c.bf16 %v241_v58, %v234_v55  ;;  %v255_v10 = vand.u32 4294901760, %v254_v49  ;;  %2416 = vset.pattern.permute.xlu0 %v2442_v51  ;;  %2417 = vset.pattern.permute.xlu1 %v2442_v51  ;;  %v268_v22 = vsub.f32 %v2597_v57, %v267_v13 }
  0x22   :  { %2182 = vmatpush3.bf16.xpose.msra.mxu1 %v2555_v37  ;;  %2278 = vmatpush3.bf16.xpose.msra.mxu0 %v2555_v37  ;;  %v262_v24 = vand.u32 4294901760, %v261_v20  ;;  %v274_v31 = vand.u32 4294901760, %v2601_v59  ;;  %v281_v32 = vand.u32 4294901760, %v2603_v60  ;;  %v2307_v39 = vpack.c.bf16 %v267_v13, %v260_v11 }
  0x23   :  { %2184 = vmatprep.subr.bf16.mxu1 %v2569_v44  ;;  %2280 = vmatprep.subr.bf16.mxu0 %v2569_v44  ;;  %v2207_v52 = vpack.c.bf16 %v255_v10, %v248_v9  ;;  %v269_v27 = vand.u32 4294901760, %v268_v22  ;;  %v302_v55 = vand.u32 4294901760, %v2652_v18  ;;  %v309_v58 = vand.u32 4294901760, %v2654_v19 }
  0x24   :  { %51 = vperm.xlu0 %2416, %v47_v14   ;;  %v275_v56 = vsub.f32 %v2601_v59, %v274_v31  ;;  %v282_v57 = vsub.f32 %v2603_v60, %v281_v32  ;;  %v2311_v46 = vpack.c.bf16 %v281_v32, %v274_v31  ;;  %v323_v48 = vand.u32 4294901760, %v2675_v34 }
  0x25   :  { %v2211_v38 = vpack.c.bf16 %v269_v27, %v262_v24  ;;  %v2319_v9 = vpack.c.bf16 %v309_v58, %v302_v55  ;;  %vm2444_vm1 = vmmov 0   ;;  %vm807_vm2 = vcmask 130048  }
  0x26   :  { %v276_v40 = vand.u32 4294901760, %v275_v56  ;;  %v283_v41 = vand.u32 4294901760, %v282_v57  ;;  %v324_v11 = vsub.f32 %v2675_v34, %v323_v48  ;;  %vm1282_vm3 = vcmask 64512  }
  0x28   :  { %56 = vperm.xlu0 %2416, %v48_v23  }
  0x2a   :  { %2186 = vmatpush3.bf16.xpose.msra.mxu1 %v2569_v44  ;;  %2282 = vmatpush3.bf16.xpose.msra.mxu0 %v2569_v44 }
  0x2b   :  { %2188 = vmatprep.subr.bf16.mxu1 %v2623_v2  ;;  %2284 = vmatprep.subr.bf16.mxu0 %v2623_v2 }
  0x32   :  { %2190 = vmatpush3.bf16.xpose.msra.mxu1 %v2623_v2  ;;  %2286 = vmatpush3.bf16.xpose.msra.mxu0 %v2623_v2 }
  0x33   :  { %2192 = vmatprep.subr.bf16.mxu1 %v2645_v12  ;;  %2288 = vmatprep.subr.bf16.mxu0 %v2645_v12 }
  0x3a   :  { %2194 = vmatpush3.bf16.xpose.msra.mxu1 %v2645_v12  ;;  %2290 = vmatpush3.bf16.xpose.msra.mxu0 %v2645_v12 }
  0x3b   :  { %2196 = vmatprep.subr.bf16.mxu1 %v2669_v30  ;;  %2292 = vmatprep.subr.bf16.mxu0 %v2669_v30 }
  0x42   :  { %2198 = vmatpush3.bf16.xpose.msra.mxu1 %v2669_v30  ;;  %2294 = vmatpush3.bf16.xpose.msra.mxu0 %v2669_v30 }
  0x43   :  { %2200 = vmatprep.subr.bf16.mxu1 %v2199_v43  ;;  %2296 = vmatprep.subr.bf16.mxu0 %v2295_v45 }
  0x49   :  { %1918 = vmatmul.mubr.f32.vlgmr.msra.gmra.mrb[0].mxu1 %v209_v3  ;;  %2023 = vmatmul.mubr.f32.vlgmr.msra.gmra.mrb[0].mxu0 %v207_v42  ;;  %v288_v42 = vand.u32 4294901760, %v2627_v5  ;;  %v303_v3 = vsub.f32 %v2652_v18, %v302_v55 }
  0x4a   :  { %2202 = vmatpush3.bf16.xpose.msra.mxu1 %v2199_v43  ;;  %2298 = vmatpush3.bf16.xpose.msra.mxu0 %v2295_v45  ;;  %v295_v43 = vand.u32 4294901760, %v2629_v6  ;;  %v2215_v45 = vpack.c.bf16 %v283_v41, %v276_v40  ;;  %v1271_v41 = vld [vmem:[%s2822_s5] sm:$0x1]  ;;  %s2446_s5 = smov [#allocation3]  }
  0x4b   :  { %2204 = vmatprep.subr.bf16.mxu1 %v2203_v4  ;;  %2300 = vmatprep.subr.bf16.mxu0 %v2299_v8  ;;  %v289_v47 = vsub.f32 %v2627_v5, %v288_v42  ;;  %v304_v5 = vand.u32 4294901760, %v303_v3  ;;  %s1739_s19 = sshll.u32 %s2446_s5, 4  ;;  %s1740_s19 = int_to_ptr.vmem [resolvable:$true] %s1739_s19 }
  0x4c   :  { %1952 = vmatprep.mubr.f32.mxu1 %v2534_v25  ;;  %2057 = vmatprep.mubr.f32.mxu0 %v2534_v25  ;;  %v296_v50 = vsub.f32 %v2629_v6, %v295_v43  ;;  %v2315_v63 = vpack.c.bf16 %v295_v43, %v288_v42  ;;  %v1284_v42 = vsel %vm1282_vm3, %v1271_v41, 0  ;;  %s2418_s20 = scalar_lea.vmem %s1740_s19, 16  ;;  %s2422_s21 = scalar_lea.vmem %s1740_s19, 32 }
  0x4d   :  { %v290_v59 = vand.u32 4294901760, %v289_v47  ;;  %v1352_v43 = vand.u32 4294901760, %v1284_v42  ;;  %p2419_p0 = scmp.ne.s32.totalorder %s1740_s19, %s2418_s20  ;;  %p2423_p1 = scmp.lt.s32.totalorder %s1740_s19, %s1740_s19 }
  0x4e   :  { %v297_v60 = vand.u32 4294901760, %v296_v50  ;;  %p2424_p2 = scmp.lt.s32.totalorder %s2422_s21, %s2418_s20 }
  0x50   :  { %v2219_v62 = vpack.c.bf16 %v297_v60, %v290_v59  ;;  %p2425_p3 = por %p2424_p2, %p2423_p1 }
  0x52   :  { %2206 = vmatpush3.bf16.xpose.msra.mxu1 %v2203_v4  ;;  %2302 = vmatpush3.bf16.xpose.msra.mxu0 %v2299_v8  ;;  %v310_v4 = vsub.f32 %v2654_v19, %v309_v58  ;;  %v316_v8 = vand.u32 4294901760, %v2673_v33  ;;  %v325_v19 = vand.u32 4294901760, %v324_v11  ;;  %p2426_p4 = pnand %p2425_p3, %p2419_p0 }
  0x53   :  { %2208 = vmatprep.subr.bf16.mxu1 %v2207_v52  ;;  %2304 = vmatprep.subr.bf16.mxu0 %v2303_v17 }
  0x54   :  { %v311_v6 = vand.u32 4294901760, %v310_v4  ;;  %v317_v10 = vsub.f32 %v2673_v33, %v316_v8  ;;  %v2323_v14 = vpack.c.bf16 %v323_v48, %v316_v8  ;;  %v1278_v8 = vlaneseq }
  0x56   :  { %v2223_v49 = vpack.c.bf16 %v311_v6, %v304_v5  ;;  %v318_v18 = vand.u32 4294901760, %v317_v10  ;;  %v1279_v48 = vshrl.u32 %v1278_v8, 7 }
  0x58   :  { %v2227_v13 = vpack.c.bf16 %v325_v19, %v318_v18 }
  0x5a   :  { %2210 = vmatpush3.bf16.xpose.msra.mxu1 %v2207_v52  ;;  %2306 = vmatpush3.bf16.xpose.msra.mxu0 %v2303_v17 }
  0x5b   :  { %2212 = vmatprep.subr.bf16.mxu1 %v2211_v38  ;;  %2308 = vmatprep.subr.bf16.mxu0 %v2307_v39 }
  0x62   :  { %2214 = vmatpush3.bf16.xpose.msra.mxu1 %v2211_v38  ;;  %2310 = vmatpush3.bf16.xpose.msra.mxu0 %v2307_v39 }
  0x63   :  { %2216 = vmatprep.subr.bf16.mxu1 %v2215_v45  ;;  %2312 = vmatprep.subr.bf16.mxu0 %v2311_v46 }
  0x6a   :  { %2218 = vmatpush3.bf16.xpose.msra.mxu1 %v2215_v45  ;;  %2314 = vmatpush3.bf16.xpose.msra.mxu0 %v2311_v46  ;;  %v1353_v45 = vsub.f32 %v1284_v42, %v1352_v43 }
  0x6b   :  { %2220 = vmatprep.subr.bf16.mxu1 %v2219_v62  ;;  %2316 = vmatprep.subr.bf16.mxu0 %v2315_v63 }
  0x6c   :  { %v1354_v46 = vand.u32 4294901760, %v1353_v45 }
  0x6e   :  { %v1355_v59 = vsub.f32 %v1353_v45, %v1354_v46 }
  0x72   :  { %2222 = vmatpush3.bf16.xpose.msra.mxu1 %v2219_v62  ;;  %2318 = vmatpush3.bf16.xpose.msra.mxu0 %v2315_v63  ;;  %v1356_v62 = vand.u32 4294901760, %v1355_v59 }
  0x73   :  { %2224 = vmatprep.subr.bf16.mxu1 %v2223_v49  ;;  %2320 = vmatprep.subr.bf16.mxu0 %v2319_v9 }
  0x7a   :  { %2226 = vmatpush3.bf16.xpose.msra.mxu1 %v2223_v49  ;;  %2322 = vmatpush3.bf16.xpose.msra.mxu0 %v2319_v9  ;;  %v1280_v49 = vsub.s32 0, %v1279_v48 }
  0x7b   :  { %2228 = vmatprep.subr.bf16.mxu1 %v2227_v13  ;;  %2324 = vmatprep.subr.bf16.mxu0 %v2323_v14 }
  0x82   :  { %2230 = vmatpush3.bf16.xpose.msra.mxu1 %v2227_v13  ;;  %2326 = vmatpush3.bf16.xpose.msra.mxu0 %v2323_v14 }
  0x83   :  { %2232 = vmatprep.subr.bf16.mxu1 %v2587_v53  ;;  %2328 = vmatprep.subr.bf16.mxu0 %v2512_v15 }
  0x89   :  { %1953 = vmatmul.mubr.f32.vlgmr.msra.gmra.mrb[0].mxu1 %v2667_v28  ;;  %2058 = vmatmul.mubr.f32.vlgmr.msra.gmra.mrb[0].mxu0 %v2667_v28 }
  0x8a   :  { %2234 = vmatpush3.bf16.xpose.msra.mxu1 %v2587_v53  ;;  %2330 = vmatpush3.bf16.xpose.msra.mxu0 %v2512_v15  ;;  %v2443_v15 = vmov 0.0|0.0  }
  0x8b   :  { %2236 = vmatprep.subr.bf16.mxu1 %v2591_v54  ;;  %2332 = vmatprep.subr.bf16.mxu0 %v2514_v16 }
  0x8c   :  { %1987 = vmatprep.mubr.f32.mxu1 %v2541_v29  ;;  %2092 = vmatprep.mubr.f32.mxu0 %v2534_v25  ;;  %v801_v25 = vld [vmem:[%s2821_s4] sm:$0xff] }
  0x8d   :  { %804 = vperm.xlu1 %2417, %v801_v25   ;;  %v800_v29 = vld [vmem:[%s2820_s3] sm:$0xff] }
  0x92   :  { %2238 = vmatpush3.bf16.xpose.msra.mxu1 %v2591_v54  ;;  %2334 = vmatpush3.bf16.xpose.msra.mxu0 %v2514_v16  ;;  %v2445_v16 = vmov 0.0  }
  0x93   :  { %2240 = vmatprep.subr.bf16.mxu1 %v2607_v61  ;;  %2336 = vmatprep.subr.bf16.mxu0 %v2536_v26 }
  0x9a   :  { %2242 = vmatpush3.bf16.xpose.msra.mxu1 %v2607_v61  ;;  %2338 = vmatpush3.bf16.xpose.msra.mxu0 %v2536_v26  ;;  %v1272_v26 = vld [vmem:[#allocation2] sm:$0x1] }
  0x9b   :  { %2244 = vmatprep.subr.bf16.mxu1 %v2617_v0  ;;  %2340 = vmatprep.subr.bf16.mxu0 %v2555_v37 }
  0x9c   :  { %1275 = vperm.xlu1 %2417, %v1272_v26  }
  0xa2   :  { %2246 = vmatpush3.bf16.xpose.msra.mxu1 %v2617_v0  ;;  %2342 = vmatpush3.bf16.xpose.msra.mxu0 %v2555_v37  ;;  %v809_v37 = vsel %vm807_vm2, %v800_v29, 0 }
  0xa3   :  { %2248 = vmatprep.subr.bf16.mxu1 %v2621_v1  ;;  %2344 = vmatprep.subr.bf16.mxu0 %v2569_v44  ;;  %v878_v53 = vand.u32 4294901760, %v809_v37 }
  0xa5   :  { %v879_v61 = vsub.f32 %v809_v37, %v878_v53 }
  0xaa   :  { %2250 = vmatpush3.bf16.xpose.msra.mxu1 %v2621_v1  ;;  %2346 = vmatpush3.bf16.xpose.msra.mxu0 %v2569_v44  ;;  %v52_v44 = vpop.permute.xlu0 %51 }
  0xab   :  { %2252 = vmatprep.subr.bf16.mxu1 %v2635_v7  ;;  %2348 = vmatprep.subr.bf16.mxu0 %v2623_v2 }
  0xae   :  { %v57_v54 = vpop.permute.xlu0 %56 }
  0xb2   :  { %2254 = vmatpush3.bf16.xpose.msra.mxu1 %v2635_v7  ;;  %2350 = vmatpush3.bf16.xpose.msra.mxu0 %v2623_v2 }
  0xb3   :  { %2256 = vmatprep.subr.bf16.mxu1 %v2661_v21  ;;  %2352 = vmatprep.subr.bf16.mxu0 %v2645_v12 }
  0xba   :  { %2258 = vmatpush3.bf16.xpose.msra.mxu1 %v2661_v21  ;;  %2354 = vmatpush3.bf16.xpose.msra.mxu0 %v2645_v12 }
  0xbb   :  { %2260 = vmatprep.subr.bf16.mxu1 %v2684_v36  ;;  %2356 = vmatprep.subr.bf16.mxu0 %v2669_v30 }
  0xc2   :  { %2262 = vmatpush3.bf16.xpose.msra.mxu1 %v2684_v36  ;;  %2358 = vmatpush3.bf16.xpose.msra.mxu0 %v2669_v30  ;;  %v880_v30 = vand.u32 4294901760, %v879_v61 }
  0xc3   :  { %2359 = vmatprep.subr.bf16.mxu0 %v2443_v15  ;;  %2137 = vmatprep.subr.mxu1 %v2445_v16 }
  0xc4   :  { %v881_v51 = vsub.f32 %v879_v61, %v880_v30 }
  0xc6   :  { %v882_v24 = vand.u32 4294901760, %v881_v51 }
  0xc9   :  { %1988 = vmatmul.mubr.f32.vlgmr.msra.gmra.mrb[0].mxu1 %v2678_v35  ;;  %2093 = vmatmul.mubr.f32.vlgmr.msra.gmra.mrb[0].mxu0 %v2667_v28 }
  0xca   :  { %2099 = vmatprep.mubr.msk.f32.mxu0 %vm2444_vm1, %v2445_v16  ;;  %2139 = vmatprep.mubr.msk.f32.mxu1 %vm2444_vm1, %v2445_v16 }
 0x10c   :  { %v805_v47 = vpop.permute.xlu1 %804 }
 0x11b   :  { %v1276_v9 = vpop.permute.xlu1 %1275 }
 0x11c   :  { %v1281_v10 = vrot.slane %v1276_v9, %v1280_v49 }
 0x19c   :  { %v1989_v0 = vpop.f32.mrb[0].mxu1  ;;  %v2094_v1 = vpop.f32.mrb[0].mxu0 }
 0x19d   :  { %v2377_v2 = vadd.f32 %v1989_v0, %v57_v54  ;;  %v472_v7 = vpop.f32.mrb[1].mxu1  ;;  %v788_v12 = vpop.f32.mrb[1].mxu0 }
 0x19e   :  { %v2379_v21 = vadd.f32 %v472_v7, %v52_v44 }
 0x19f   :  { %v2378_v28 = vadd.f32 %v2377_v2, %v2094_v1 }
 0x1a0   :  { %v2380_v33 = vadd.f32 %v2379_v21, %v788_v12 }
 0x1a1   :  { %v799_v34 = vmax.f32 %v2378_v28, 0.0 }
 0x1a2   :  { %v798_v35 = vmax.f32 %v2380_v33, 0.0 }
 0x1a3   :  { %v815_v36 = vand.u32 4294901760, %v799_v34 }
 0x1a4   :  { %v812_v52 = vand.u32 4294901760, %v798_v35 }
 0x1a5   :  { %v897_v17 = vsub.f32 %v799_v34, %v815_v36 }
 0x1a6   :  { %v2360_v20 = vpack.c.bf16 %v815_v36, %v812_v52  ;;  %v890_v22 = vsub.f32 %v798_v35, %v812_v52 }
 0x1a7   :  { %v898_v23 = vand.u32 4294901760, %v897_v17 }
 0x1a8   :  { %v891_v27 = vand.u32 4294901760, %v890_v22  ;;  %2361 = vmatpush3.bf16.msra.mxu0 %v2360_v20  ;;  %v2366_v31 = vpack.c.bf16 %v897_v17, %v890_v22 }
 0x1a9   :  { %v899_v32 = vsub.f32 %v897_v17, %v898_v23  ;;  %2362 = vmatprep.subr.bf16.mxu0 %v2443_v15 }
 0x1aa   :  { %v892_v38 = vsub.f32 %v890_v22, %v891_v27  ;;  %v2372_v39 = vpack.c.bf16 %v898_v23, %v891_v27 }
 0x1ab   :  { %v900_v56 = vand.u32 4294901760, %v899_v32  ;;  %2100 = vmatmul.mubr.f32.vlgmr.msra.gmra.mrb[2].mxu0 %v882_v24 }
 0x1ac   :  { %v893_v57 = vand.u32 4294901760, %v892_v38  ;;  %2106 = vmatprep.mubr.msk.f32.mxu0 %vm2444_vm1, %v2445_v16 }
 0x1ae   :  { %v2363_v40 = vpack.c.bf16 %v900_v56, %v893_v57 }
 0x1b0   :  { %2364 = vmatpush3.bf16.msra.mxu0 %v2363_v40 }
 0x1b1   :  { %2365 = vmatprep.subr.bf16.mxu0 %v2443_v15 }
 0x1b3   :  { %2107 = vmatmul.mubr.f32.vlgmr.msra.gmra.mrb[2].mxu0 %v878_v53 }
 0x1b4   :  { %2367 = vmatpush3.bf16.msra.mxu0 %v2366_v31  ;;  %2113 = vmatprep.mubr.msk.f32.mxu0 %vm2444_vm1, %v2445_v16 }
 0x1b5   :  { %2368 = vmatprep.subr.bf16.mxu0 %v2443_v15 }
 0x1bb   :  { %2114 = vmatmul.mubr.f32.vlgmr.msra.gmra.mrb[2].mxu0 %v879_v61 }
 0x1bc   :  { %2370 = vmatpush3.bf16.msra.mxu0 %v2360_v20  ;;  %2120 = vmatprep.mubr.msk.f32.mxu0 %vm2444_vm1, %v2445_v16 }
 0x1bd   :  { %2371 = vmatprep.subr.bf16.mxu0 %v2443_v15 }
 0x1c3   :  { %2121 = vmatmul.mubr.f32.vlgmr.msra.gmra.mrb[2].mxu0 %v880_v30 }
 0x1c4   :  { %2373 = vmatpush3.bf16.msra.mxu0 %v2372_v39  ;;  %2127 = vmatprep.mubr.msk.f32.mxu0 %vm2444_vm1, %v2445_v16 }
 0x1c5   :  { %2374 = vmatprep.subr.bf16.mxu0 %v2443_v15 }
 0x1cb   :  { %2128 = vmatmul.mubr.f32.vlgmr.msra.gmra.mrb[2].mxu0 %v878_v53 }
 0x1cc   :  { %2376 = vmatpush3.bf16.msra.mxu0 %v2360_v20  ;;  %2134 = vmatprep.mubr.msk.f32.mxu0 %vm2444_vm1, %v2445_v16 }
 0x1d3   :  { %2135 = vmatmul.mubr.f32.vlgmr.msra.gmra.mrb[2].mxu0 %v878_v53 }
 0x2a6   :  { %v1266_v50 = vpop.f32.mrb[2].mxu0 }
 0x2a7   :  { %v2381_v60 = vadd.f32 %v1266_v50, %v805_v47  ;;  %v2136_v55 = vpop.f32.mrb[3].mxu0 }
 0x2a9   :  { %v1270_v58 = vmax.f32 %v2381_v60, 0.0 }
 0x2ab   :  { %v1287_v63 = vand.u32 4294901760, %v1270_v58 }
 0x2ad   :  { %v1364_v3 = vsub.f32 %v1270_v58, %v1287_v63  ;;  %2138 = vmatpush3.msra.mxu1 %v1287_v63 }
 0x2ae   :  { %2140 = vmatmul.mubr.f32.vlgmr.msra.gmra.mrb[2].mxu1 %v1356_v62  ;;  %2142 = vmatprep.subr.mxu1 %v2445_v16 }
 0x2af   :  { %v1365_v4 = vand.u32 4294901760, %v1364_v3  ;;  %2144 = vmatprep.mubr.msk.f32.mxu1 %vm2444_vm1, %v2445_v16 }
 0x2b1   :  { %v1366_v5 = vsub.f32 %v1364_v3, %v1365_v4 }
 0x2b3   :  { %v1367_v6 = vand.u32 4294901760, %v1366_v5 }
 0x2b5   :  { %2143 = vmatpush3.msra.mxu1 %v1367_v6 }
 0x2b6   :  { %2145 = vmatmul.mubr.f32.vlgmr.msra.gmra.mrb[2].mxu1 %v1352_v43  ;;  %2147 = vmatprep.subr.mxu1 %v2445_v16 }
 0x2b7   :  { %2148 = vmatpush3.msra.mxu1 %v1364_v3  ;;  %2149 = vmatprep.mubr.msk.f32.mxu1 %vm2444_vm1, %v2445_v16 }
 0x2b8   :  { %2152 = vmatprep.subr.mxu1 %v2445_v16 }
 0x2be   :  { %2150 = vmatmul.mubr.f32.vlgmr.msra.gmra.mrb[2].mxu1 %v1353_v45 }
 0x2bf   :  { %2153 = vmatpush3.msra.mxu1 %v1287_v63  ;;  %2154 = vmatprep.mubr.msk.f32.mxu1 %vm2444_vm1, %v2445_v16 }
 0x2c0   :  { %2157 = vmatprep.subr.mxu1 %v2445_v16 }
 0x2c6   :  { %2155 = vmatmul.mubr.f32.vlgmr.msra.gmra.mrb[2].mxu1 %v1354_v46 }
 0x2c7   :  { %2158 = vmatpush3.msra.mxu1 %v1365_v4  ;;  %2159 = vmatprep.mubr.msk.f32.mxu1 %vm2444_vm1, %v2445_v16 }
 0x2c8   :  { %2162 = vmatprep.subr.mxu1 %v2445_v16 }
 0x2ce   :  { %2160 = vmatmul.mubr.f32.vlgmr.msra.gmra.mrb[2].mxu1 %v1352_v43 }
 0x2cf   :  { %2163 = vmatpush3.msra.mxu1 %v1287_v63  ;;  %2164 = vmatprep.mubr.msk.f32.mxu1 %vm2444_vm1, %v2445_v16 }
 0x2d6   :  { %2165 = vmatmul.mubr.f32.vlgmr.msra.gmra.mrb[2].mxu1 %v1352_v43 }
 0x3a9   :  { %v1728_v11 = vpop.f32.mrb[2].mxu1 }
 0x3aa   :  { %v2382_v18 = vadd.f32 %v1728_v11, %v1281_v10  ;;  %v2166_v19 = vpop.f32.mrb[3].mxu1 }
 0x3ac   :  { %1732 = vst [vmem:[#allocation3] sm:$0x1] %v2382_v18 }
 0x3ad   :  { %2429 = shalt.err (!%p2426_p4)
}
 0x3ae   :  { %s2430_s24 = scalar_lea.hbm %s2824_s7, 16 }
 0x3af   :  { %p2431_p5 = scmp.ne.s32.totalorder %s2824_s7, %s2430_s24  ;;  %p2434_p6 = scmp.lt.u32.totalorder %s2430_s24, %s2824_s7 }
 0x3b1   :  { %p2436_p7 = pnand %p2434_p6, %p2431_p5 }
 0x3b3   :  { %2439 = shalt.err (!%p2436_p7)
}
 0x3b4   :  { %1742 = dma.vmem_to_hbm [thread:$0]  %s1740_s19, 16, %s2824_s7, [#allocation4]  }
 0x3b5   :  { %2440 = dma.done.wait [#allocation4], 16  }
 0x3b6   :  { %2441 = vsyncadd [#allocation4], 4294967280 }
 0x3b7   :  { %1746 = vsyncpa [#allocation4], 1 }

</bundles_post_ra>
